<compile_context>
chip_gen: v6e
topology: v6e:2x2x1
jax: 0.10.0
libtpu: 0.0.40
codegen_flags: <defaults>
</compile_context>

<pallas_src>
import functools
import math

import jax
import jax.numpy as jnp
from jax import lax
from jax.experimental import pallas as pl
from jax.experimental.pallas import tpu as pltpu


# ----------------------------- packed-parameter layout -----------------------------
def _round_up(x, m):
    return (x + m - 1) // m * m


def _slab_layout(h_feats, hid, out_feat):
    """Row offsets of [W1^T | W2^T | W3^T | b1,b2,b3] inside one lane-padded f32 slab."""
    off_w1 = 0
    off_w2 = _round_up(h_feats, 8)
    off_w3 = off_w2 + _round_up(hid, 8)
    off_b = off_w3 + _round_up(hid, 8)
    rows = off_b + 8                                  # 3 bias rows, padded to a sublane tile
    width = _round_up(max(hid, out_feat), 128)        # lane-dense slab width
    return off_w1, off_w2, off_w3, off_b, rows, width


def pack_params(params, h_feats, out_feat):
    """One-time packing (init-time, NOT per forward): weights pre-transposed to (in, out)."""
    w1, b1, w2, b2, w3, b3 = params
    hid = h_feats // 2
    off_w1, off_w2, off_w3, off_b, rows, width = _slab_layout(h_feats, hid, out_feat)
    slab = jnp.zeros((rows, width), jnp.float32)
    slab = slab.at[off_w1:off_w1 + h_feats, :hid].set(jnp.asarray(w1, jnp.float32).T)
    slab = slab.at[off_w2:off_w2 + hid, :hid].set(jnp.asarray(w2, jnp.float32).T)
    slab = slab.at[off_w3:off_w3 + hid, :out_feat].set(jnp.asarray(w3, jnp.float32).T)
    slab = slab.at[off_b + 0, :hid].set(jnp.asarray(b1, jnp.float32))
    slab = slab.at[off_b + 1, :hid].set(jnp.asarray(b2, jnp.float32))
    slab = slab.at[off_b + 2, :out_feat].set(jnp.asarray(b3, jnp.float32))
    return slab


# ----------------------------------- kernel ----------------------------------------
def _fused_kernel(h_ref, t_ref, p_ref, o_ref, *, hid, off_w1, off_w2, off_w3, off_b):
    # h_ref : (num_nodes, in_feats) f32   node embeddings
    # t_ref : (items, T*C)          i32   flattened triplet indices
    # p_ref : (rows, width)         f32   packed [W1^T | W2^T | W3^T | b1,b2,b3]
    # o_ref : (1, out_feat)         f32   softmax probabilities (lane-dense row)
    num_nodes, in_feats = h_ref.shape
    items, tc = t_ref.shape
    out_feat = o_ref.shape[1]
    h_feats = tc * in_feats                   # == items (module as-written constraint)

    # -------- fused gather + mean (no (items, h_feats) intermediate) --------
    #   mean_i = (1/h_feats) * sum_j rowsum(h)[tflat[i, j]]
    #          = (1/h_feats) * sum_n countsT[n, i] * rowsum(h)[n]
    t = t_ref[...]                                                       # (items, tc)
    n_iota = lax.broadcasted_iota(jnp.int32, (num_nodes, items, tc), 0)
    onehot = (t[None, :, :] == n_iota).astype(jnp.float32)               # (num_nodes, items, tc)
    countsT = jnp.sum(onehot, axis=2)                                    # (num_nodes, items)

    hsum = jnp.sum(h_ref[...].astype(jnp.float32), axis=1, keepdims=True)    # (num_nodes, 1)
    emb = jnp.sum(hsum * countsT, axis=0, keepdims=True) * (1.0 / h_feats)   # (1, items)==(1, h_feats)

    # -------- MLP: W3(relu(W2(relu(W1(emb))))) --------
    # Static slices of the packed slab; weights are (in, out) so the MXU contracts
    # on the activation's last (lane) axis — no transposes anywhere.
    w1t = p_ref[off_w1:off_w1 + h_feats, 0:hid]
    w2t = p_ref[off_w2:off_w2 + hid, 0:hid]
    w3t = p_ref[off_w3:off_w3 + hid, 0:out_feat]
    b1 = p_ref[off_b + 0:off_b + 1, 0:hid]
    b2 = p_ref[off_b + 1:off_b + 2, 0:hid]
    b3 = p_ref[off_b + 2:off_b + 3, 0:out_feat]

    h1 = jnp.maximum(jnp.dot(emb, w1t, preferred_element_type=jnp.float32) + b1, 0.0)
    h2 = jnp.maximum(jnp.dot(h1, w2t, preferred_element_type=jnp.float32) + b2, 0.0)
    logits = jnp.dot(h2, w3t, preferred_element_type=jnp.float32) + b3        # (1, out_feat)

    # -------- numerically-stable softmax over the lane axis, EXACT division --------
    m = jnp.max(logits, axis=-1, keepdims=True)
    e = jnp.exp(logits - m)
    o_ref[...] = e / jnp.sum(e, axis=-1, keepdims=True)


# ---------------------------------- wrapper -----------------------------------------
def triplet_predictor_forward(h, triplets, packed_params, h_feats, out_feat):
    """Exact forward of TripletPredictor (as written). Returns shape (out_feat,)."""
    items, trip, cand = triplets.shape
    num_nodes, in_feats = h.shape
    assert trip * cand * in_feats == h_feats, "code-as-written requires T*C*D == h_feats"
    assert items == h_feats, "code-as-written requires items == h_feats"

    hid = h_feats // 2
    off_w1, off_w2, off_w3, off_b, rows, width = _slab_layout(h_feats, hid, out_feat)
    assert packed_params.shape == (rows, width)

    tc = trip * cand
    tflat = triplets.reshape(items, tc).astype(jnp.int32)   # trailing-dim collapse (free)

    flops = (num_nodes * in_feats                            # row sums
             + 2 * num_nodes * items * tc                    # one-hot compare + count
             + 2 * num_nodes * items                         # weighted sublane reduce
             + 2 * (h_feats * hid + hid * hid + hid * out_feat)  # MLP
             + 4 * out_feat)                                 # softmax epilogue
    bytes_accessed = (h.size * h.dtype.itemsize + tflat.size * 4
                      + packed_params.size * 4 + out_feat * 4)

    kernel = functools.partial(_fused_kernel, hid=hid,
                               off_w1=off_w1, off_w2=off_w2, off_w3=off_w3, off_b=off_b)

    vmem = pl.BlockSpec(memory_space=pltpu.MemorySpace.VMEM)
    out = pl.pallas_call(
        kernel,
        out_shape=jax.ShapeDtypeStruct((1, out_feat), jnp.float32),
        in_specs=[vmem, vmem, vmem],
        out_specs=vmem,
        cost_estimate=pl.CostEstimate(flops=int(flops),
                                      transcendentals=int(out_feat),
                                      bytes_accessed=int(bytes_accessed)),
    )(h, tflat, packed_params)
    return out.reshape(out_feat)


# ------------------------------ pure-JAX reference ----------------------------------
def ref_forward(h, triplets, params, h_feats):
    items, trip, cand = triplets.shape
    e = h[triplets.reshape(items, trip * cand)].reshape(items, h_feats)
    x = e.mean(axis=1)                       # (items,) treated as one sample of h_feats features
    w1, b1, w2, b2, w3, b3 = params
    x = jax.nn.relu(x @ w1.T + b1)
    x = jax.nn.relu(x @ w2.T + b2)
    x = x @ w3.T + b3
    return jax.nn.softmax(x)


# --------------------------------- param init ---------------------------------------
def init_linear(kw, kb, fan_in, fan_out):
    bound = 1.0 / math.sqrt(fan_in)
    w = jax.random.uniform(kw, (fan_out, fan_in), jnp.float32, -bound, bound)
    b = jax.random.uniform(kb, (fan_out,), jnp.float32, -bound, bound)
    return w, b


if __name__ == "__main__":
    # Small shapes consistent with the module's (as-written) forward constraints.
    in_feats = 4            # feature dim D of node embeddings h
    h_feats = 32            # module hidden size
    out_feat = 8
    num_nodes = 16
    trip, cand = 2, 4       # T*C*D = 2*4*4 = 32 = h_feats
    items = h_feats         # required so the 1-D mean vector matches W1's in_features

    key = jax.random.PRNGKey(0)
    kh, kt, k1w, k1b, k2w, k2b, k3w, k3b = jax.random.split(key, 8)

    h = jax.random.normal(kh, (num_nodes, in_feats), jnp.float32)
    triplets = jax.random.randint(kt, (items, trip, cand), 0, num_nodes, jnp.int32)

    w1, b1 = init_linear(k1w, k1b, h_feats, h_feats // 2)
    w2, b2 = init_linear(k2w, k2b, h_feats // 2, h_feats // 2)
    w3, b3 = init_linear(k3w, k3b, h_feats // 2, out_feat)
    params = (w1, b1, w2, b2, w3, b3)

    packed = pack_params(params, h_feats, out_feat)   # one-time packing (init path)

    out = triplet_predictor_forward(h, triplets, packed, h_feats, out_feat)
    out = jax.block_until_ready(out)

    ref = ref_forward(h, triplets, params, h_feats)
    assert out.shape == (out_feat,)
    # Exact softmax division restored -> f32-level tolerance (only fp summation-order
    # drift remains from the fused mean formulation).
    assert jnp.allclose(out, ref, atol=1e-5, rtol=1e-5), (out, ref)

    print("KERNEL_OK")
</pallas_src>

<mosaic_0001>
module attributes {stable_mosaic.version = 11 : i64} {
  func.func @_fused_kernel(%arg0: memref<16x4xf32, #tpu.memory_space<vmem>>, %arg1: memref<32x8xi32, #tpu.memory_space<vmem>>, %arg2: memref<72x128xf32, #tpu.memory_space<vmem>>, %arg3: memref<1x8xf32, #tpu.memory_space<vmem>>) attributes {dimension_semantics = [], scalar_prefetch = 0 : i64, scratch_operands = 0 : i64, tpu.core_type = #tpu.core_type<tc>} {
    %c0 = arith.constant 0 : index
    %c0_0 = arith.constant 0 : index
    %0 = vector.load %arg1[%c0, %c0_0] : memref<32x8xi32, #tpu.memory_space<vmem>>, vector<32x8xi32>
    %1 = tpu.iota {dimensions = array<i32: 0>} : vector<16x32x8xi32>
    %2 = vector.shape_cast %0 : vector<32x8xi32> to vector<1x32x8xi32>
    %3 = vector.broadcast %2 : vector<1x32x8xi32> to vector<16x32x8xi32>
    %4 = arith.cmpi eq, %3, %1 : vector<16x32x8xi32>
    %5 = arith.extui %4 : vector<16x32x8xi1> to vector<16x32x8xi32>
    %6 = arith.sitofp %5 : vector<16x32x8xi32> to vector<16x32x8xf32>
    %cst = arith.constant dense<0.000000e+00> : vector<16x32xf32>
    %7 = vector.multi_reduction <add>, %6, %cst [2] : vector<16x32x8xf32> to vector<16x32xf32>
    %c0_1 = arith.constant 0 : index
    %c0_2 = arith.constant 0 : index
    %8 = vector.load %arg0[%c0_1, %c0_2] : memref<16x4xf32, #tpu.memory_space<vmem>>, vector<16x4xf32>
    %cst_3 = arith.constant dense<0.000000e+00> : vector<16xf32>
    %9 = vector.multi_reduction <add>, %8, %cst_3 [1] : vector<16x4xf32> to vector<16xf32>
    %10 = vector.shape_cast %9 : vector<16xf32> to vector<16x1xf32>
    %11 = vector.broadcast %10 : vector<16x1xf32> to vector<16x32xf32>
    %12 = arith.mulf %11, %7 : vector<16x32xf32>
    %cst_4 = arith.constant dense<0.000000e+00> : vector<32xf32>
    %13 = vector.multi_reduction <add>, %12, %cst_4 [0] : vector<16x32xf32> to vector<32xf32>
    %14 = vector.shape_cast %13 : vector<32xf32> to vector<1x32xf32>
    %cst_5 = arith.constant 3.125000e-02 : f32
    %15 = vector.broadcast %cst_5 : f32 to vector<1x32xf32>
    %16 = arith.mulf %14, %15 : vector<1x32xf32>
    %c0_6 = arith.constant 0 : index
    %c0_7 = arith.constant 0 : index
    %17 = vector.load %arg2[%c0_6, %c0_7] : memref<72x128xf32, #tpu.memory_space<vmem>>, vector<32x16xf32>
    %c32 = arith.constant 32 : index
    %c0_8 = arith.constant 0 : index
    %18 = vector.load %arg2[%c32, %c0_8] : memref<72x128xf32, #tpu.memory_space<vmem>>, vector<16x16xf32>
    %c48 = arith.constant 48 : index
    %c0_9 = arith.constant 0 : index
    %19 = vector.load %arg2[%c48, %c0_9] : memref<72x128xf32, #tpu.memory_space<vmem>>, vector<16x8xf32>
    %c64 = arith.constant 64 : index
    %c0_10 = arith.constant 0 : index
    %20 = vector.load %arg2[%c64, %c0_10] : memref<72x128xf32, #tpu.memory_space<vmem>>, vector<1x16xf32>
    %c65 = arith.constant 65 : index
    %c0_11 = arith.constant 0 : index
    %21 = vector.load %arg2[%c65, %c0_11] : memref<72x128xf32, #tpu.memory_space<vmem>>, vector<1x16xf32>
    %c66 = arith.constant 66 : index
    %c0_12 = arith.constant 0 : index
    %22 = vector.load %arg2[%c66, %c0_12] : memref<72x128xf32, #tpu.memory_space<vmem>>, vector<1x8xf32>
    %cst_13 = arith.constant dense<0.000000e+00> : vector<1x16xf32>
    %23 = tpu.matmul %16, %17, %cst_13 {dimension_numbers = #tpu.dot_dimension_numbers<[1], [0], [0], [1], [0, 0, 1, 1], [], []>} : vector<1x32xf32>, vector<32x16xf32>, vector<1x16xf32> -> vector<1x16xf32>
    %24 = arith.addf %23, %20 : vector<1x16xf32>
    %cst_14 = arith.constant 0.000000e+00 : f32
    %25 = vector.broadcast %cst_14 : f32 to vector<1x16xf32>
    %26 = arith.maximumf %24, %25 : vector<1x16xf32>
    %cst_15 = arith.constant dense<0.000000e+00> : vector<1x16xf32>
    %27 = tpu.matmul %26, %18, %cst_15 {dimension_numbers = #tpu.dot_dimension_numbers<[1], [0], [0], [1], [0, 0, 1, 1], [], []>} : vector<1x16xf32>, vector<16x16xf32>, vector<1x16xf32> -> vector<1x16xf32>
    %28 = arith.addf %27, %21 : vector<1x16xf32>
    %cst_16 = arith.constant 0.000000e+00 : f32
    %29 = vector.broadcast %cst_16 : f32 to vector<1x16xf32>
    %30 = arith.maximumf %28, %29 : vector<1x16xf32>
    %cst_17 = arith.constant dense<0.000000e+00> : vector<1x8xf32>
    %31 = tpu.matmul %30, %19, %cst_17 {dimension_numbers = #tpu.dot_dimension_numbers<[1], [0], [0], [1], [0, 0, 1, 1], [], []>} : vector<1x16xf32>, vector<16x8xf32>, vector<1x8xf32> -> vector<1x8xf32>
    %32 = arith.addf %31, %22 : vector<1x8xf32>
    %cst_18 = arith.constant dense<0xFF800000> : vector<1xf32>
    %33 = vector.multi_reduction <maximumf>, %32, %cst_18 [1] : vector<1x8xf32> to vector<1xf32>
    %34 = vector.shape_cast %33 : vector<1xf32> to vector<1x1xf32>
    %35 = vector.broadcast %34 : vector<1x1xf32> to vector<1x8xf32>
    %36 = arith.subf %32, %35 : vector<1x8xf32>
    %37 = math.exp %36 : vector<1x8xf32>
    %cst_19 = arith.constant dense<0.000000e+00> : vector<1xf32>
    %38 = vector.multi_reduction <add>, %37, %cst_19 [1] : vector<1x8xf32> to vector<1xf32>
    %39 = vector.shape_cast %38 : vector<1xf32> to vector<1x1xf32>
    %40 = vector.broadcast %39 : vector<1x1xf32> to vector<1x8xf32>
    %41 = arith.divf %37, %40 : vector<1x8xf32>
    %c0_20 = arith.constant 0 : index
    %c0_21 = arith.constant 0 : index
    %42 = vector.load %arg3[%c0_20, %c0_21] : memref<1x8xf32, #tpu.memory_space<vmem>>, vector<1x8xf32>
    tpu.vector_store %arg3[%c0_20, %c0_21], %41 {strides = array<i32>} : memref<1x8xf32, #tpu.memory_space<vmem>>, vector<1x8xf32>,
    return
  }
}

</mosaic_0001>

<bundles_post_ra>
// kernel: tpu_custom_call.1
= control target key start
LH: loop header
LB: loop body
LE: loop exit
PB: predicated region body
PF: predicated region fallthrough
CT: control target
= control target key end

     0   :  { %8 = vsyncpa [#allocation3], 0  ;;  %s1769_s0 = inlined_call_operand.vmem [shape: f32[16,4], index: 0, kind: input, shape index: {}]   ;;  %s1770_s1 = inlined_call_operand.vmem [shape: s32[32,8], index: 1, kind: input, shape index: {}]   ;;  %s1771_s2 = inlined_call_operand.hbm [shape: f32[72,128], index: 2, kind: input, shape index: {}]   ;;  %s1772_s3 = inlined_call_operand.hbm [shape: f32[1,8], index: 3, kind: output, shape index: {}]  }
   0x1   :  { %9 = vsyncpa [#allocation4], 0  ;;  %s1257_s12 = smov [#allocation2]  }
   0x2   :  { %s19_s13 = sshll.u32 %s1257_s12, 4  ;;  %s20_s13 = int_to_ptr.vmem [resolvable:$true] %s19_s13 }
   0x3   :  { %s1221_s14 = scalar_lea.vmem %s20_s13, 1152  ;;  %p1226_p1 = scmp.lt.s32.totalorder %s20_s13, %s20_s13 }
   0x4   :  { %p1222_p0 = scmp.ne.s32.totalorder %s20_s13, %s1221_s14  ;;  %p1227_p2 = scmp.lt.s32.totalorder %s1221_s14, %s1221_s14 }
   0x6   :  { %p1228_p3 = por %p1227_p2, %p1226_p1 }
   0x8   :  { %p1229_p4 = pnand %p1228_p3, %p1222_p0 }
   0xa   :  { %1232 = shalt.err (!%p1229_p4)
}
   0xb   :  { %s1258_s15 = smov 128   ;;  %s1259_s16 = smov 8  }
   0xc   :  { %25 = dma.hbm_to_vmem [thread:$0]  %s1771_s2, 1152, %s20_s13, [#allocation3], %s1258_s15, %s1258_s15, %s1259_s16  }
   0xd   :  { %1253 = dma.done.wait [#allocation3], 1152  }
   0xe   :  { %1254 = vsyncadd [#allocation3], 4294966144  ;;  %v1260_v0 = vmov 0.0   ;;  %v1291_v1 = vld [vmem:[%s1770_s1] sm:$0xff]  ;;  %vm225_vm0 = vcmask 64512   ;;  %v1296_v2 = vld [vmem:[%s1770_s1 + $0x8] sm:$0xff] }
   0xf   :  { %1178 = vmatprep.subr.mxu0 %v1260_v0  ;;  %1189 = vmatprep.subr.mxu1 %v1260_v0  ;;  %vm37_vm1 = vcmp.eq.s32.totalorder %v1291_v1, 1  ;;  %vm33_vm2 = vcmp.eq.s32.totalorder %v1291_v1, 0  ;;  %vm38_vm3 = vcmp.eq.s32.totalorder %v1296_v2, 1  ;;  %vm34_vm4 = vcmp.eq.s32.totalorder %v1296_v2, 0  ;;  %v1319_v13 = vld [vmem:[%s1770_s1 + $0x10] sm:$0xff]  ;;  %v1340_v24 = vld [vmem:[%s1770_s1 + $0x18] sm:$0xff] }
  0x10   :  { %v1104_v3 = vsel %vm37_vm1, 1.0, %v1260_v0  ;;  %v1100_v4 = vsel %vm33_vm2, 1.0, %v1260_v0  ;;  %v1105_v5 = vsel %vm38_vm3, 1.0, %v1260_v0  ;;  %v1101_v6 = vsel %vm34_vm4, 1.0, %v1260_v0 }
  0x11   :  { %v238_v7 = vsel %vm225_vm0, %v1104_v3, 0.0  ;;  %v226_v8 = vsel %vm225_vm0, %v1100_v4, 0.0  ;;  %vm66_vm5 = vcmp.eq.s32.totalorder %v1296_v2, 8  ;;  %vm65_vm6 = vcmp.eq.s32.totalorder %v1291_v1, 8 }
  0x12   :  { %239 = vadd.xlane.f32.xlu1 %v238_v7  ;;  %227 = vadd.xlane.f32.xlu0 %v226_v8  ;;  %v241_v9 = vsel %vm225_vm0, %v1105_v5, 0.0  ;;  %v229_v10 = vsel %vm225_vm0, %v1101_v6, 0.0  ;;  %v1133_v11 = vsel %vm66_vm5, 1.0, %v1260_v0  ;;  %v1132_v12 = vsel %vm65_vm6, 1.0, %v1260_v0 }
  0x13   :  { %vm70_vm7 = vcmp.eq.s32.totalorder %v1296_v2, 9  ;;  %vm69_vm8 = vcmp.eq.s32.totalorder %v1291_v1, 9  ;;  %v325_v14 = vsel %vm225_vm0, %v1133_v11, 0.0  ;;  %v322_v15 = vsel %vm225_vm0, %v1132_v12, 0.0 }
  0x14   :  { %v1137_v16 = vsel %vm70_vm7, 1.0, %v1260_v0  ;;  %v1136_v17 = vsel %vm69_vm8, 1.0, %v1260_v0  ;;  %vm39_vm9 = vcmp.eq.s32.totalorder %v1319_v13, 1  ;;  %vm35_vm10 = vcmp.eq.s32.totalorder %v1319_v13, 0 }
  0x15   :  { %v337_v18 = vsel %vm225_vm0, %v1137_v16, 0.0  ;;  %v334_v19 = vsel %vm225_vm0, %v1136_v17, 0.0  ;;  %v1106_v20 = vsel %vm39_vm9, 1.0, %v1260_v0  ;;  %v1102_v21 = vsel %vm35_vm10, 1.0, %v1260_v0 }
  0x16   :  { %242 = vadd.xlane.f32.xlu1 %v241_v9  ;;  %230 = vadd.xlane.f32.xlu0 %v229_v10  ;;  %vm42_vm11 = vcmp.eq.s32.totalorder %v1296_v2, 2  ;;  %vm41_vm12 = vcmp.eq.s32.totalorder %v1291_v1, 2  ;;  %v244_v22 = vsel %vm225_vm0, %v1106_v20, 0.0  ;;  %v232_v23 = vsel %vm225_vm0, %v1102_v21, 0.0 }
  0x17   :  { %vm71_vm13 = vcmp.eq.s32.totalorder %v1319_v13, 9  ;;  %vm67_vm14 = vcmp.eq.s32.totalorder %v1319_v13, 8  ;;  %v1109_v25 = vsel %vm42_vm11, 1.0, %v1260_v0  ;;  %v1108_v26 = vsel %vm41_vm12, 1.0, %v1260_v0 }
  0x18   :  { %vm74_vm15 = vcmp.eq.s32.totalorder %v1296_v2, 10  ;;  %vm73_vm1 = vcmp.eq.s32.totalorder %v1291_v1, 10  ;;  %v1138_v27 = vsel %vm71_vm13, 1.0, %v1260_v0  ;;  %v1134_v28 = vsel %vm67_vm14, 1.0, %v1260_v0 }
  0x19   :  { %vm40_vm2 = vcmp.eq.s32.totalorder %v1340_v24, 1  ;;  %v253_v29 = vsel %vm225_vm0, %v1109_v25, 0.0  ;;  %v250_v30 = vsel %vm225_vm0, %v1108_v26, 0.0  ;;  %v1141_v31 = vsel %vm74_vm15, 1.0, %v1260_v0 }
  0x1a   :  { %326 = vadd.xlane.f32.xlu1 %v325_v14  ;;  %323 = vadd.xlane.f32.xlu0 %v322_v15  ;;  %vm36_vm3 = vcmp.eq.s32.totalorder %v1340_v24, 0  ;;  %v1140_v32 = vsel %vm73_vm1, 1.0, %v1260_v0  ;;  %vm45_vm4 = vcmp.eq.s32.totalorder %v1291_v1, 3  ;;  %v340_v33 = vsel %vm225_vm0, %v1138_v27, 0.0 }
  0x1b   :  { %v328_v34 = vsel %vm225_vm0, %v1134_v28, 0.0  ;;  %v1107_v35 = vsel %vm40_vm2, 1.0, %v1260_v0  ;;  %vm43_vm5 = vcmp.eq.s32.totalorder %v1319_v13, 2  ;;  %v349_v36 = vsel %vm225_vm0, %v1141_v31, 0.0 }
  0x1c   :  { %v1103_v37 = vsel %vm36_vm3, 1.0, %v1260_v0  ;;  %vm68_vm6 = vcmp.eq.s32.totalorder %v1340_v24, 8  ;;  %vm46_vm7 = vcmp.eq.s32.totalorder %v1296_v2, 3  ;;  %v346_v38 = vsel %vm225_vm0, %v1140_v32, 0.0 }
  0x1d   :  { %v1112_v39 = vsel %vm45_vm4, 1.0, %v1260_v0  ;;  %vm75_vm8 = vcmp.eq.s32.totalorder %v1319_v13, 10  ;;  %vm81_vm9 = vcmp.eq.s32.totalorder %v1291_v1, 12  ;;  %v247_v40 = vsel %vm225_vm0, %v1107_v35, 0.0 }
  0x1e   :  { %338 = vadd.xlane.f32.xlu1 %v337_v18  ;;  %335 = vadd.xlane.f32.xlu0 %v334_v19  ;;  %v1110_v41 = vsel %vm43_vm5, 1.0, %v1260_v0  ;;  %vm72_vm10 = vcmp.eq.s32.totalorder %v1340_v24, 9  ;;  %v1148_v42 = vsel %vm81_vm9, 1.0, %v1260_v0  ;;  %v235_v43 = vsel %vm225_vm0, %v1103_v37, 0.0 }
  0x1f   :  { %v1135_v44 = vsel %vm68_vm6, 1.0, %v1260_v0  ;;  %v1113_v45 = vsel %vm46_vm7, 1.0, %v1260_v0  ;;  %v1375_v46 = vsel %vm225_vm0, %v1148_v42, 0.0  ;;  %v262_v47 = vsel %vm225_vm0, %v1112_v39, 0.0 }
  0x20   :  { %v1142_v48 = vsel %vm75_vm8, 1.0, %v1260_v0  ;;  %vm54_vm11 = vcmp.eq.s32.totalorder %v1296_v2, 5  ;;  %vm53_vm12 = vcmp.eq.s32.totalorder %v1291_v1, 5  ;;  %v256_v49 = vsel %vm225_vm0, %v1110_v41, 0.0 }
  0x21   :  { %v1139_v50 = vsel %vm72_vm10, 1.0, %v1260_v0  ;;  %v1121_v51 = vsel %vm54_vm11, 1.0, %v1260_v0  ;;  %v1120_v52 = vsel %vm53_vm12, 1.0, %v1260_v0  ;;  %v1386_v53 = vsel %vm225_vm0, %v1135_v44, 0.0 }
  0x22   :  { %245 = vadd.xlane.f32.xlu1 %v244_v22  ;;  %233 = vadd.xlane.f32.xlu0 %v232_v23  ;;  %v1389_v54 = vsel %vm225_vm0, %v1113_v45, 0.0  ;;  %v1392_v55 = vsel %vm225_vm0, %v1121_v51, 0.0  ;;  %v1395_v56 = vsel %vm225_vm0, %v1120_v52, 0.0  ;;  %v1398_v57 = vsel %vm225_vm0, %v1142_v48, 0.0 }
  0x23   :  { %vm86_vm13 = vcmp.eq.s32.totalorder %v1296_v2, 13  ;;  %vm85_vm14 = vcmp.eq.s32.totalorder %v1291_v1, 13  ;;  %vm55_vm15 = vcmp.eq.s32.totalorder %v1319_v13, 5  ;;  %vm78_vm1 = vcmp.eq.s32.totalorder %v1296_v2, 11 }
  0x24   :  { %v1153_v58 = vsel %vm86_vm13, 1.0, %v1260_v0  ;;  %v1152_v59 = vsel %vm85_vm14, 1.0, %v1260_v0  ;;  %v1122_v60 = vsel %vm55_vm15, 1.0, %v1260_v0  ;;  %vm77_vm2 = vcmp.eq.s32.totalorder %v1291_v1, 11 }
  0x25   :  { %v1409_v61 = vsel %vm225_vm0, %v1153_v58, 0.0  ;;  %v1412_v62 = vsel %vm225_vm0, %v1152_v59, 0.0  ;;  %v1415_v63 = vsel %vm225_vm0, %v1122_v60, 0.0  ;;  %v1418_v3 = vsel %vm225_vm0, %v1139_v50, 0.0 }
  0x26   :  { %254 = vadd.xlane.f32.xlu1 %v253_v29  ;;  %251 = vadd.xlane.f32.xlu0 %v250_v30  ;;  %vm58_vm3 = vcmp.eq.s32.totalorder %v1296_v2, 6  ;;  %vm57_vm4 = vcmp.eq.s32.totalorder %v1291_v1, 6  ;;  %vm87_vm5 = vcmp.eq.s32.totalorder %v1319_v13, 13  ;;  %v1424_v4 = vsel %vm78_vm1, 1.0, %v1260_v0 }
  0x27   :  { %v1125_v5 = vsel %vm58_vm3, 1.0, %v1260_v0  ;;  %v1124_v6 = vsel %vm57_vm4, 1.0, %v1260_v0  ;;  %v1154_v7 = vsel %vm87_vm5, 1.0, %v1260_v0  ;;  %v1144_v8 = vsel %vm77_vm2, 1.0, %v1260_v0 }
  0x28   :  { %v1431_v9 = vsel %vm225_vm0, %v1125_v5, 0.0  ;;  %v1434_v10 = vsel %vm225_vm0, %v1124_v6, 0.0  ;;  %v1437_v11 = vsel %vm225_vm0, %v1154_v7, 0.0  ;;  %vm90_vm6 = vcmp.eq.s32.totalorder %v1296_v2, 14 }
  0x29   :  { %vm89_vm7 = vcmp.eq.s32.totalorder %v1291_v1, 14  ;;  %vm59_vm8 = vcmp.eq.s32.totalorder %v1319_v13, 6  ;;  %vm56_vm9 = vcmp.eq.s32.totalorder %v1340_v24, 5  ;;  %v1157_v12 = vsel %vm90_vm6, 1.0, %v1260_v0 }
  0x2a   :  { %341 = vadd.xlane.f32.xlu1 %v340_v33  ;;  %329 = vadd.xlane.f32.xlu0 %v328_v34  ;;  %v1156_v14 = vsel %vm89_vm7, 1.0, %v1260_v0  ;;  %v1126_v15 = vsel %vm59_vm8, 1.0, %v1260_v0  ;;  %v1123_v16 = vsel %vm56_vm9, 1.0, %v1260_v0  ;;  %vm47_vm10 = vcmp.eq.s32.totalorder %v1319_v13, 3 }
  0x2b   :  { %vm44_vm11 = vcmp.eq.s32.totalorder %v1340_v24, 2  ;;  %v1450_v17 = vsel %vm225_vm0, %v1157_v12, 0.0  ;;  %v1453_v18 = vsel %vm225_vm0, %v1156_v14, 0.0  ;;  %v1456_v19 = vsel %vm225_vm0, %v1126_v15, 0.0 }
  0x2c   :  { %v1459_v20 = vsel %vm225_vm0, %v1123_v16, 0.0  ;;  %vm62_vm12 = vcmp.eq.s32.totalorder %v1296_v2, 7  ;;  %vm61_vm13 = vcmp.eq.s32.totalorder %v1291_v1, 7  ;;  %vm91_vm14 = vcmp.eq.s32.totalorder %v1319_v13, 14 }
  0x2d   :  { %vm88_vm15 = vcmp.eq.s32.totalorder %v1340_v24, 13  ;;  %v1129_v21 = vsel %vm62_vm12, 1.0, %v1260_v0  ;;  %v1128_v22 = vsel %vm61_vm13, 1.0, %v1260_v0  ;;  %v1158_v23 = vsel %vm91_vm14, 1.0, %v1260_v0 }
  0x2e   :  { %350 = vadd.xlane.f32.xlu1 %v349_v36  ;;  %347 = vadd.xlane.f32.xlu0 %v346_v38  ;;  %v1155_v25 = vsel %vm88_vm15, 1.0, %v1260_v0  ;;  %v1470_v26 = vsel %vm225_vm0, %v1129_v21, 0.0  ;;  %v1473_v27 = vsel %vm225_vm0, %v1128_v22, 0.0  ;;  %v1476_v28 = vsel %vm225_vm0, %v1158_v23, 0.0 }
  0x2f   :  { %v1479_v29 = vsel %vm225_vm0, %v1155_v25, 0.0  ;;  %vm94_vm1 = vcmp.eq.s32.totalorder %v1296_v2, 15  ;;  %vm93_vm2 = vcmp.eq.s32.totalorder %v1291_v1, 15  ;;  %vm63_vm3 = vcmp.eq.s32.totalorder %v1319_v13, 7 }
  0x30   :  { %vm60_vm4 = vcmp.eq.s32.totalorder %v1340_v24, 6  ;;  %v1161_v30 = vsel %vm94_vm1, 1.0, %v1260_v0  ;;  %v1160_v31 = vsel %vm93_vm2, 1.0, %v1260_v0  ;;  %v1130_v32 = vsel %vm63_vm3, 1.0, %v1260_v0 }
  0x31   :  { %v1127_v33 = vsel %vm60_vm4, 1.0, %v1260_v0  ;;  %v1492_v34 = vsel %vm225_vm0, %v1161_v30, 0.0  ;;  %v1495_v35 = vsel %vm225_vm0, %v1160_v31, 0.0  ;;  %v1498_v36 = vsel %vm225_vm0, %v1130_v32, 0.0 }
  0x32   :  { %248 = vadd.xlane.f32.xlu1 %v247_v40  ;;  %236 = vadd.xlane.f32.xlu0 %v235_v43  ;;  %v1501_v37 = vsel %vm225_vm0, %v1127_v33, 0.0  ;;  %vm95_vm5 = vcmp.eq.s32.totalorder %v1319_v13, 15  ;;  %vm92_vm6 = vcmp.eq.s32.totalorder %v1340_v24, 14  ;;  %vm96_vm7 = vcmp.eq.s32.totalorder %v1340_v24, 15 }
  0x33   :  { %vm64_vm8 = vcmp.eq.s32.totalorder %v1340_v24, 7  ;;  %v1162_v38 = vsel %vm95_vm5, 1.0, %v1260_v0  ;;  %v1159_v39 = vsel %vm92_vm6, 1.0, %v1260_v0  ;;  %v1163_v40 = vsel %vm96_vm7, 1.0, %v1260_v0 }
  0x34   :  { %v1131_v41 = vsel %vm64_vm8, 1.0, %v1260_v0  ;;  %v1514_v42 = vsel %vm225_vm0, %v1162_v38, 0.0  ;;  %v1517_v43 = vsel %vm225_vm0, %v1159_v39, 0.0  ;;  %v1520_v44 = vsel %vm225_vm0, %v1163_v40, 0.0  ;;  %v842_v39 = vld [vmem:[#allocation2 + $0x18] sm:$0xff] }
  0x35   :  { %v1523_v45 = vsel %vm225_vm0, %v1131_v41, 0.0  ;;  %v358_v48 = vsel %vm225_vm0, %v1144_v8, 0.0  ;;  %v1111_v50 = vsel %vm44_vm11, 1.0, %v1260_v0  ;;  %vm50_vm9 = vcmp.eq.s32.totalorder %v1296_v2, 4  ;;  %1179 = vmatpush3.msra.mxu0 %v842_v39 }
  0x36   :  { %263 = vadd.xlane.f32.xlu1 %v262_v47  ;;  %257 = vadd.xlane.f32.xlu0 %v256_v49  ;;  %v361_v47 = vsel %vm225_vm0, %v1424_v4, 0.0  ;;  %v1114_v49 = vsel %vm47_vm10, 1.0, %v1260_v0  ;;  %vm49_vm12 = vcmp.eq.s32.totalorder %v1291_v1, 4  ;;  %v259_v52 = vsel %vm225_vm0, %v1111_v50, 0.0 }
  0x37   :  { %v268_v51 = vsel %vm225_vm0, %v1114_v49, 0.0  ;;  %vm79_vm10 = vcmp.eq.s32.totalorder %v1319_v13, 11  ;;  %vm76_vm13 = vcmp.eq.s32.totalorder %v1340_v24, 10  ;;  %vm82_vm11 = vcmp.eq.s32.totalorder %v1296_v2, 12  ;;  %1180 = vmatprep.subr.mxu0 %v1260_v0  ;;  %v839_v49 = vld [vmem:[#allocation2] sm:$0xff] }
  0x38   :  { %v1146_v58 = vsel %vm79_vm10, 1.0, %v1260_v0  ;;  %v1143_v59 = vsel %vm76_vm13, 1.0, %v1260_v0  ;;  %v1149_v4 = vsel %vm82_vm11, 1.0, %v1260_v0  ;;  %vm51_vm14 = vcmp.eq.s32.totalorder %v1319_v13, 4 }
  0x39   :  { %v364_v60 = vsel %vm225_vm0, %v1146_v58, 0.0  ;;  %vm48_vm15 = vcmp.eq.s32.totalorder %v1340_v24, 3  ;;  %v373_v5 = vsel %vm225_vm0, %v1149_v4, 0.0  ;;  %v1118_v6 = vsel %vm51_vm14, 1.0, %v1260_v0 }
  0x3a   :  { %332 = vadd.xlane.f32.xlu1 %v1386_v53  ;;  %266 = vadd.xlane.f32.xlu0 %v1389_v54  ;;  %v1117_v53 = vsel %vm50_vm9, 1.0, %v1260_v0  ;;  %v1116_v54 = vsel %vm49_vm12, 1.0, %v1260_v0  ;;  %v1115_v2 = vsel %vm48_vm15, 1.0, %v1260_v0  ;;  %v280_v7 = vsel %vm225_vm0, %v1118_v6, 0.0 }
  0x3b   :  { %v274_v1 = vsel %vm225_vm0, %v1116_v54, 0.0  ;;  %v271_v8 = vsel %vm225_vm0, %v1115_v2, 0.0  ;;  %vm83_vm1 = vcmp.eq.s32.totalorder %v1319_v13, 12  ;;  %vm80_vm2 = vcmp.eq.s32.totalorder %v1340_v24, 11 }
  0x3c   :  { %v1150_v12 = vsel %vm83_vm1, 1.0, %v1260_v0  ;;  %v1147_v14 = vsel %vm80_vm2, 1.0, %v1260_v0  ;;  %vm52_vm3 = vcmp.eq.s32.totalorder %v1340_v24, 4  ;;  %vm84_vm4 = vcmp.eq.s32.totalorder %v1340_v24, 12  ;;  %v419_v24 = vld [vmem:[%s1769_s0 + $0x8] sm:$0xff] }
  0x3d   :  { %v367_v15 = vsel %vm225_vm0, %v1147_v14, 0.0  ;;  %v1119_v13 = vsel %vm52_vm3, 1.0, %v1260_v0  ;;  %vm502_vm5 = vcmask 130112   ;;  %vm1261_vm6 = vmmov 0  }
  0x3e   :  { %353 = vadd.xlane.f32.xlu1 %v1398_v57  ;;  %344 = vadd.xlane.f32.xlu0 %v1418_v3  ;;  %v277_v57 = vsel %vm225_vm0, %v1117_v53, 0.0  ;;  %v355_v3 = vsel %vm225_vm0, %v1143_v59, 0.0  ;;  %v283_v16 = vsel %vm225_vm0, %v1119_v13, 0.0  ;;  %vm509_vm7 = vcmask 195712  }
  0x3f   :  { %1186 = vmatprep.mubr.msk.f32.mxu0 %vm1261_vm6, %v1260_v0  ;;  %1193 = vmatprep.mubr.msk.f32.mxu1 %vm1261_vm6, %v1260_v0  ;;  %vm516_vm8 = vcmask 261312   ;;  %vm803_vm9 = vcmask 1041409   ;;  %vm805_vm12 = vcmask 1042434   ;;  %vm807_vm10 = vcmask 1043459  }
  0x40   :  { %vm809_vm13 = vcmask 1044484   ;;  %vm811_vm11 = vcmask 1045509   ;;  %vm813_vm14 = vcmask 1046534   ;;  %vm815_vm15 = vcmask 1047559  }
  0x41   :  { %vm828_vm1 = vcmask 261120   ;;  %vm924_vm2 = vcmask 130048   ;;  %vm1072_vm3 = vcmask 57344  }
  0x42   :  { %362 = vadd.xlane.f32.xlu1 %v361_v47  ;;  %359 = vadd.xlane.f32.xlu0 %v358_v48 }
  0x46   :  { %269 = vadd.xlane.f32.xlu1 %v268_v51  ;;  %260 = vadd.xlane.f32.xlu0 %v259_v52 }
  0x4a   :  { %278 = vadd.xlane.f32.xlu1 %v277_v57  ;;  %275 = vadd.xlane.f32.xlu0 %v274_v1 }
  0x4e   :  { %365 = vadd.xlane.f32.xlu1 %v364_v60  ;;  %356 = vadd.xlane.f32.xlu0 %v355_v3 }
  0x52   :  { %374 = vadd.xlane.f32.xlu1 %v373_v5  ;;  %371 = vadd.xlane.f32.xlu0 %v1375_v46  ;;  %v376_v46 = vsel %vm225_vm0, %v1150_v12, 0.0 }
  0x56   :  { %281 = vadd.xlane.f32.xlu1 %v280_v7  ;;  %272 = vadd.xlane.f32.xlu0 %v271_v8 }
  0x5a   :  { %290 = vadd.xlane.f32.xlu1 %v1392_v55  ;;  %287 = vadd.xlane.f32.xlu0 %v1395_v56  ;;  %v1151_v55 = vsel %vm84_vm4, 1.0, %v1260_v0 }
  0x5b   :  { %v379_v56 = vsel %vm225_vm0, %v1151_v55, 0.0  ;;  %vm420_vm0 = vcmask 31744  }
  0x5e   :  { %377 = vadd.xlane.f32.xlu1 %v376_v46  ;;  %368 = vadd.xlane.f32.xlu0 %v367_v15 }
  0x62   :  { %386 = vadd.xlane.f32.xlu1 %v1409_v61  ;;  %383 = vadd.xlane.f32.xlu0 %v1412_v62  ;;  %v418_v61 = vld [vmem:[%s1769_s0] sm:$0xff]  ;;  %v424_v62 = vsel %vm420_vm0, %v419_v24, 0.0  ;;  %s1262_s0 = smov [#allocation5]  }
  0x63   :  { %s1091_s29 = sshll.u32 %s1262_s0, 4  ;;  %s1092_s29 = int_to_ptr.vmem [resolvable:$true] %s1091_s29 }
  0x64   :  { %s1233_s30 = scalar_lea.vmem %s1092_s29, 16  ;;  %s1237_s4 = scalar_lea.vmem %s1092_s29, 32 }
  0x65   :  { %p1234_p5 = scmp.ne.s32.totalorder %s1092_s29, %s1233_s30  ;;  %p1238_p6 = scmp.lt.s32.totalorder %s1092_s29, %s1092_s29 }
  0x66   :  { %293 = vadd.xlane.f32.xlu1 %v1415_v63  ;;  %284 = vadd.xlane.f32.xlu0 %v283_v16  ;;  %v421_v63 = vsel %vm420_vm0, %v418_v61, 0.0  ;;  %p1239_p7 = scmp.lt.s32.totalorder %s1237_s4, %s1233_s30 }
  0x68   :  { %p1240_p8 = por %p1239_p7, %p1238_p6 }
  0x6a   :  { %302 = vadd.xlane.f32.xlu1 %v1431_v9  ;;  %299 = vadd.xlane.f32.xlu0 %v1434_v10  ;;  %v491_v9 = vlaneseq  ;;  %p1241_p9 = pnand %p1240_p8, %p1234_p5 }
  0x6c   :  { %v492_v10 = vand.u32 127, %v491_v9 }
  0x6e   :  { %389 = vadd.xlane.f32.xlu1 %v1437_v11  ;;  %380 = vadd.xlane.f32.xlu0 %v379_v56  ;;  %v1600_v11 = vshrl.u32 %v491_v9, 7  ;;  %v511_v6 = vadd.s32 4294967272, %v492_v10 }
  0x70   :  { %v1644_v15 = vsub.s32 %v511_v6, %v1600_v11 }
  0x72   :  { %398 = vadd.xlane.f32.xlu1 %v1450_v17  ;;  %395 = vadd.xlane.f32.xlu0 %v1453_v18  ;;  %v497_v17 = vadd.s32 4294967288, %v492_v10 }
  0x74   :  { %v1606_v21 = vsub.s32 %v497_v17, %v1600_v11 }
  0x76   :  { %305 = vadd.xlane.f32.xlu1 %v1456_v19  ;;  %296 = vadd.xlane.f32.xlu0 %v1459_v20  ;;  %v1603_v20 = vsub.s32 %v492_v10, %v1600_v11 }
  0x7a   :  { %314 = vadd.xlane.f32.xlu1 %v1470_v26  ;;  %311 = vadd.xlane.f32.xlu0 %v1473_v27 }
  0x7e   :  { %401 = vadd.xlane.f32.xlu1 %v1476_v28  ;;  %392 = vadd.xlane.f32.xlu0 %v1479_v29 }
  0x82   :  { %410 = vadd.xlane.f32.xlu1 %v1492_v34  ;;  %407 = vadd.xlane.f32.xlu0 %v1495_v35  ;;  %v504_v35 = vadd.s32 4294967280, %v492_v10 }
  0x86   :  { %317 = vadd.xlane.f32.xlu1 %v1498_v36  ;;  %308 = vadd.xlane.f32.xlu0 %v1501_v37 }
  0x8a   :  { %413 = vadd.xlane.f32.xlu1 %v1514_v42  ;;  %404 = vadd.xlane.f32.xlu0 %v1517_v43  ;;  %v1620_v42 = vsub.s32 %v504_v35, %v1600_v11  ;;  %v841_v43 = vld [vmem:[#allocation2 + $0x10] sm:$0xff] }
  0x8b   :  { %1181 = vmatpush3.msra.mxu0 %v841_v43 }
  0x8c   :  { %1182 = vmatprep.subr.mxu0 %v1260_v0 }
  0x8e   :  { %416 = vadd.xlane.f32.xlu1 %v1520_v44  ;;  %320 = vadd.xlane.f32.xlu0 %v1523_v45  ;;  %v840_v44 = vld [vmem:[#allocation2 + $0x8] sm:$0xff] }
  0x8f   :  { %1183 = vmatpush3.msra.mxu0 %v840_v44 }
  0x90   :  { %1184 = vmatprep.subr.mxu0 %v1260_v0 }
  0x91   :  { %1185 = vmatpush3.msra.mxu0 %v839_v49 }
  0x92   :  { %425 = vadd.xlane.f32.xlu1 %v424_v62  ;;  %422 = vadd.xlane.f32.xlu0 %v421_v63 }
  0x9b   :  { %v240_v18 = vpop.xlane.xlu1 %239  ;;  %v228_v19 = vpop.xlane.xlu0 %227 }
  0x9c   :  { %v521_v25 = vrot.slane %v240_v18, %v1603_v20  ;;  %v496_v26 = vrot.slane %v228_v19, %v1603_v20 }
  0x9f   :  { %v243_v22 = vpop.xlane.xlu1 %242  ;;  %v231_v23 = vpop.xlane.xlu0 %230 }
  0xa0   :  { %v525_v27 = vrot.slane %v243_v22, %v1606_v21  ;;  %v501_v28 = vrot.slane %v231_v23, %v1606_v21 }
  0xa2   :  { %v526_v29 = vsel %vm502_vm5, %v525_v27, %v521_v25  ;;  %v503_v30 = vsel %vm502_vm5, %v501_v28, %v496_v26 }
  0xa3   :  { %v327_v31 = vpop.xlane.xlu1 %326  ;;  %v324_v32 = vpop.xlane.xlu0 %323 }
  0xa4   :  { %v658_v33 = vrot.slane %v327_v31, %v1606_v21  ;;  %v654_v34 = vrot.slane %v324_v32, %v1603_v20 }
  0xa6   :  { %v659_v36 = vsel %vm502_vm5, %v658_v33, %v654_v34 }
  0xa7   :  { %v339_v37 = vpop.xlane.xlu1 %338  ;;  %v336_v38 = vpop.xlane.xlu0 %335 }
  0xa8   :  { %v677_v40 = vrot.slane %v339_v37, %v1606_v21  ;;  %v673_v41 = vrot.slane %v336_v38, %v1603_v20 }
  0xaa   :  { %v678_v45 = vsel %vm502_vm5, %v677_v40, %v673_v41 }
  0xab   :  { %v246_v47 = vpop.xlane.xlu1 %245  ;;  %v234_v48 = vpop.xlane.xlu0 %233 }
  0xac   :  { %v530_v50 = vrot.slane %v246_v47, %v1620_v42  ;;  %v508_v51 = vrot.slane %v234_v48, %v1620_v42 }
  0xae   :  { %v531_v52 = vsel %vm509_vm7, %v530_v50, %v526_v29  ;;  %v510_v53 = vsel %vm509_vm7, %v508_v51, %v503_v30 }
  0xaf   :  { %v255_v54 = vpop.xlane.xlu1 %254  ;;  %v252_v57 = vpop.xlane.xlu0 %251 }
  0xb0   :  { %v544_v1 = vrot.slane %v255_v54, %v1606_v21  ;;  %v540_v58 = vrot.slane %v252_v57, %v1603_v20 }
  0xb2   :  { %v545_v59 = vsel %vm502_vm5, %v544_v1, %v540_v58 }
  0xb3   :  { %v342_v60 = vpop.xlane.xlu1 %341  ;;  %v330_v3 = vpop.xlane.xlu0 %329 }
  0xb4   :  { %v682_v4 = vrot.slane %v342_v60, %v1620_v42  ;;  %v663_v5 = vrot.slane %v330_v3, %v1620_v42 }
  0xb6   :  { %v683_v2 = vsel %vm509_vm7, %v682_v4, %v678_v45  ;;  %v664_v7 = vsel %vm509_vm7, %v663_v5, %v659_v36 }
  0xb7   :  { %v351_v8 = vpop.xlane.xlu1 %350  ;;  %v348_v12 = vpop.xlane.xlu0 %347 }
  0xb8   :  { %v696_v14 = vrot.slane %v351_v8, %v1606_v21  ;;  %v692_v46 = vrot.slane %v348_v12, %v1603_v20 }
  0xba   :  { %v697_v13 = vsel %vm502_vm5, %v696_v14, %v692_v46 }
  0xbb   :  { %v249_v16 = vpop.xlane.xlu1 %248  ;;  %v237_v55 = vpop.xlane.xlu0 %236 }
  0xbc   :  { %v535_v56 = vrot.slane %v249_v16, %v1644_v15  ;;  %v515_v24 = vrot.slane %v237_v55, %v1644_v15 }
  0xbe   :  { %v536_v61 = vsel %vm516_vm8, %v535_v56, %v531_v52  ;;  %v517_v62 = vsel %vm516_vm8, %v515_v24, %v510_v53 }
  0xbf   :  { %v804_v63 = vsel %vm803_vm9, %v536_v61, %v517_v62  ;;  %v264_v9 = vpop.xlane.xlu1 %263  ;;  %v258_v10 = vpop.xlane.xlu0 %257 }
  0xc0   :  { %v549_v11 = vrot.slane %v258_v10, %v1620_v42  ;;  %v559_v22 = vrot.slane %v264_v9, %v1603_v20 }
  0xc2   :  { %v550_v17 = vsel %vm509_vm7, %v549_v11, %v545_v59 }
  0xc3   :  { %v333_v18 = vpop.xlane.xlu1 %332  ;;  %v267_v19 = vpop.xlane.xlu0 %266 }
  0xc4   :  { %v668_v23 = vrot.slane %v333_v18, %v1644_v15  ;;  %v563_v25 = vrot.slane %v267_v19, %v1606_v21 }
  0xc6   :  { %v669_v26 = vsel %vm516_vm8, %v668_v23, %v664_v7  ;;  %v564_v27 = vsel %vm502_vm5, %v563_v25, %v559_v22 }
  0xc7   :  { %v354_v28 = vpop.xlane.xlu1 %353  ;;  %v345_v29 = vpop.xlane.xlu0 %344 }
  0xc8   :  { %v701_v30 = vrot.slane %v354_v28, %v1620_v42  ;;  %v687_v31 = vrot.slane %v345_v29, %v1644_v15 }
  0xca   :  { %v702_v32 = vsel %vm509_vm7, %v701_v30, %v697_v13  ;;  %v688_v33 = vsel %vm516_vm8, %v687_v31, %v683_v2 }
  0xcb   :  { %v817_v34 = vsel %vm803_vm9, %v688_v33, %v669_v26  ;;  %v363_v35 = vpop.xlane.xlu1 %362  ;;  %v360_v36 = vpop.xlane.xlu0 %359 }
  0xcc   :  { %v715_v37 = vrot.slane %v363_v35, %v1606_v21  ;;  %v711_v38 = vrot.slane %v360_v36, %v1603_v20 }
  0xce   :  { %v716_v39 = vsel %vm502_vm5, %v715_v37, %v711_v38 }
  0xcf   :  { %v270_v40 = vpop.xlane.xlu1 %269  ;;  %v261_v41 = vpop.xlane.xlu0 %260 }
  0xd0   :  { %v568_v43 = vrot.slane %v270_v40, %v1620_v42  ;;  %v554_v44 = vrot.slane %v261_v41, %v1644_v15 }
  0xd2   :  { %v569_v45 = vsel %vm509_vm7, %v568_v43, %v564_v27  ;;  %v555_v47 = vsel %vm516_vm8, %v554_v44, %v550_v17 }
  0xd3   :  { %v806_v48 = vsel %vm805_vm12, %v555_v47, %v804_v63  ;;  %v279_v49 = vpop.xlane.xlu1 %278  ;;  %v276_v50 = vpop.xlane.xlu0 %275 }
  0xd4   :  { %v582_v27 = vrot.slane %v279_v49, %v1606_v21  ;;  %v578_v28 = vrot.slane %v276_v50, %v1603_v20 }
  0xd6   :  { %v583_v41 = vsel %vm502_vm5, %v582_v27, %v578_v28 }
  0xd7   :  { %v366_v51 = vpop.xlane.xlu1 %365  ;;  %v357_v52 = vpop.xlane.xlu0 %356 }
  0xd8   :  { %v706_v53 = vrot.slane %v357_v52, %v1644_v15  ;;  %v720_v7 = vrot.slane %v366_v51, %v1620_v42 }
  0xda   :  { %v707_v54 = vsel %vm516_vm8, %v706_v53, %v702_v32  ;;  %v721_v46 = vsel %vm509_vm7, %v720_v7, %v716_v39 }
  0xdb   :  { %v818_v57 = vsel %vm805_vm12, %v707_v54, %v817_v34  ;;  %v375_v1 = vpop.xlane.xlu1 %374  ;;  %v372_v58 = vpop.xlane.xlu0 %371 }
  0xdc   :  { %v734_v29 = vrot.slane %v375_v1, %v1606_v21  ;;  %v730_v30 = vrot.slane %v372_v58, %v1603_v20 }
  0xde   :  { %v735_v43 = vsel %vm502_vm5, %v734_v29, %v730_v30 }
  0xdf   :  { %v282_v59 = vpop.xlane.xlu1 %281  ;;  %v273_v60 = vpop.xlane.xlu0 %272 }
  0xe0   :  { %v573_v3 = vrot.slane %v273_v60, %v1644_v15  ;;  %v587_v31 = vrot.slane %v282_v59, %v1620_v42 }
  0xe2   :  { %v574_v4 = vsel %vm516_vm8, %v573_v3, %v569_v45  ;;  %v588_v51 = vsel %vm509_vm7, %v587_v31, %v583_v41 }
  0xe3   :  { %v1675_v5 = vsel %vm807_vm10, %v574_v4, %v806_v48  ;;  %v291_v6 = vpop.xlane.xlu1 %290  ;;  %v288_v2 = vpop.xlane.xlu0 %287 }
  0xe4   :  { %v601_v32 = vrot.slane %v291_v6, %v1606_v21  ;;  %v597_v33 = vrot.slane %v288_v2, %v1603_v20 }
  0xe6   :  { %v602_v44 = vsel %vm502_vm5, %v601_v32, %v597_v33 }
  0xe7   :  { %v378_v8 = vpop.xlane.xlu1 %377  ;;  %v369_v12 = vpop.xlane.xlu0 %368 }
  0xe8   :  { %v725_v14 = vrot.slane %v369_v12, %v1644_v15  ;;  %v739_v36 = vrot.slane %v378_v8, %v1620_v42 }
  0xea   :  { %v726_v13 = vsel %vm516_vm8, %v725_v14, %v721_v46  ;;  %v740_v52 = vsel %vm509_vm7, %v739_v36, %v735_v43 }
  0xeb   :  { %v1681_v16 = vsel %vm807_vm10, %v726_v13, %v818_v57  ;;  %v387_v55 = vpop.xlane.xlu1 %386  ;;  %v384_v56 = vpop.xlane.xlu0 %383 }
  0xec   :  { %v753_v37 = vrot.slane %v387_v55, %v1606_v21  ;;  %v749_v38 = vrot.slane %v384_v56, %v1603_v20 }
  0xee   :  { %v754_v53 = vsel %vm502_vm5, %v753_v37, %v749_v38 }
  0xef   :  { %v294_v24 = vpop.xlane.xlu1 %293  ;;  %v285_v61 = vpop.xlane.xlu0 %284 }
  0xf0   :  { %v606_v39 = vrot.slane %v294_v24, %v1620_v42  ;;  %v592_v40 = vrot.slane %v285_v61, %v1644_v15 }
  0xf2   :  { %v607_v54 = vsel %vm509_vm7, %v606_v39, %v602_v44  ;;  %v593_v57 = vsel %vm516_vm8, %v592_v40, %v588_v51 }
  0xf3   :  { %v303_v62 = vpop.xlane.xlu1 %302  ;;  %v300_v63 = vpop.xlane.xlu0 %299 }
  0xf4   :  { %v620_v45 = vrot.slane %v303_v62, %v1606_v21  ;;  %v616_v47 = vrot.slane %v300_v63, %v1603_v20 }
  0xf6   :  { %v621_v2 = vsel %vm502_vm5, %v620_v45, %v616_v47 }
  0xf7   :  { %v390_v9 = vpop.xlane.xlu1 %389  ;;  %v381_v10 = vpop.xlane.xlu0 %380 }
  0xf8   :  { %v744_v48 = vrot.slane %v381_v10, %v1644_v15  ;;  %v758_v1 = vrot.slane %v390_v9, %v1620_v42 }
  0xfa   :  { %v745_v7 = vsel %vm516_vm8, %v744_v48, %v740_v52  ;;  %v759_v61 = vsel %vm509_vm7, %v758_v1, %v754_v53  ;;  %v844_v52 = vld [vmem:[#allocation2 + $0x28] sm:$0xff]  ;;  %v843_v53 = vld [vmem:[#allocation2 + $0x20] sm:$0xff] }
  0xfb   :  { %v399_v11 = vpop.xlane.xlu1 %398  ;;  %v396_v17 = vpop.xlane.xlu0 %395  ;;  %1190 = vmatpush3.msra.mxu1 %v844_v52 }
  0xfc   :  { %v772_v58 = vrot.slane %v399_v11, %v1606_v21  ;;  %v768_v59 = vrot.slane %v396_v17, %v1603_v20  ;;  %1191 = vmatprep.subr.mxu1 %v1260_v0 }
  0xfd   :  { %1192 = vmatpush3.msra.mxu1 %v843_v53 }
  0xfe   :  { %v773_v62 = vsel %vm502_vm5, %v772_v58, %v768_v59  ;;  %1196 = vmatprep.subr.mxu1 %v1260_v0 }
  0xff   :  { %v306_v18 = vpop.xlane.xlu1 %305  ;;  %v297_v19 = vpop.xlane.xlu0 %296 }
 0x100   :  { %v625_v60 = vrot.slane %v306_v18, %v1620_v42  ;;  %v611_v3 = vrot.slane %v297_v19, %v1644_v15  ;;  %v820_v18 = vsel %vm809_vm13, %v745_v7, %v1681_v16 }
 0x102   :  { %v626_v10 = vsel %vm509_vm7, %v625_v60, %v621_v2  ;;  %v612_v11 = vsel %vm516_vm8, %v611_v3, %v607_v54  ;;  %v847_v54 = vld [vmem:[#allocation2 + $0x40] sm:$0x1]  ;;  %v846_v60 = vld [vmem:[#allocation2 + $0x38] sm:$0xff]  ;;  %v845_v3 = vld [vmem:[#allocation2 + $0x30] sm:$0xff] }
 0x103   :  { %v1683_v22 = vpop.xlane.xlu1 %314  ;;  %v1685_v23 = vpop.xlane.xlu0 %311 }
 0x104   :  { %v639_v8 = vrot.slane %v1683_v22, %v1606_v21  ;;  %v635_v13 = vrot.slane %v1685_v23, %v1603_v20 }
 0x107   :  { %v402_v25 = vpop.xlane.xlu1 %401  ;;  %v393_v26 = vpop.xlane.xlu0 %392 }
 0x108   :  { %v777_v4 = vrot.slane %v402_v25, %v1620_v42  ;;  %v763_v6 = vrot.slane %v393_v26, %v1644_v15  ;;  %v640_v25 = vsel %vm502_vm5, %v639_v8, %v635_v13 }
 0x10a   :  { %v778_v17 = vsel %vm509_vm7, %v777_v4, %v773_v62  ;;  %v848_v4 = vld [vmem:[#allocation2 + $0x41] sm:$0x1] }
 0x10b   :  { %v411_v34 = vpop.xlane.xlu1 %410  ;;  %v408_v35 = vpop.xlane.xlu0 %407 }
 0x10c   :  { %v791_v55 = vrot.slane %v411_v34, %v1606_v21  ;;  %v787_v56 = vrot.slane %v408_v35, %v1603_v20  ;;  %v764_v21 = vsel %vm516_vm8, %v763_v6, %v759_v61  ;;  %v810_v20 = vsel %vm809_vm13, %v593_v57, %v1675_v5 }
 0x10d   :  { %v821_v16 = vsel %vm811_vm11, %v764_v21, %v820_v18  ;;  %v812_v30 = vsel %vm811_vm11, %v612_v11, %v810_v20 }
 0x10e   :  { %v792_v26 = vsel %vm502_vm5, %v791_v55, %v787_v56 }
 0x10f   :  { %v318_v49 = vpop.xlane.xlu1 %317  ;;  %v309_v50 = vpop.xlane.xlu0 %308 }
 0x110   :  { %v630_v12 = vrot.slane %v309_v50, %v1644_v15  ;;  %v644_v63 = vrot.slane %v318_v49, %v1620_v42 }
 0x112   :  { %v631_v19 = vsel %vm516_vm8, %v630_v12, %v626_v10  ;;  %v645_v29 = vsel %vm509_vm7, %v644_v63, %v640_v25  ;;  %v849_v12 = vld [vmem:[#allocation2 + $0x42] sm:$0x1] }
 0x113   :  { %v414_v14 = vpop.xlane.xlu1 %413  ;;  %v405_v46 = vpop.xlane.xlu0 %404  ;;  %v814_v34 = vsel %vm813_vm14, %v631_v19, %v812_v30 }
 0x114   :  { %v782_v24 = vrot.slane %v405_v46, %v1644_v15  ;;  %v796_v9 = vrot.slane %v414_v14, %v1620_v42 }
 0x116   :  { %v783_v22 = vsel %vm516_vm8, %v782_v24, %v778_v17  ;;  %v797_v5 = vsel %vm509_vm7, %v796_v9, %v792_v26 }
 0x117   :  { %v417_v23 = vpop.xlane.xlu1 %416  ;;  %v321_v42 = vpop.xlane.xlu0 %320  ;;  %v822_v32 = vsel %vm813_vm14, %v783_v22, %v821_v16 }
 0x118   :  { %v801_v27 = vrot.slane %v417_v23, %v1644_v15  ;;  %v649_v28 = vrot.slane %v321_v42, %v1644_v15 }
 0x11a   :  { %v802_v31 = vsel %vm516_vm8, %v801_v27, %v797_v5  ;;  %v650_v33 = vsel %vm516_vm8, %v649_v28, %v645_v29 }
 0x11b   :  { %v426_v35 = vpop.xlane.xlu1 %425  ;;  %v823_v15 = vsel %vm815_vm15, %v802_v31, %v822_v32  ;;  %v816_v36 = vsel %vm815_vm15, %v650_v33, %v814_v34  ;;  %v423_v37 = vpop.xlane.xlu0 %422 }
 0x11c   :  { %v827_v38 = vmul.f32 %v823_v15, %v426_v35  ;;  %v826_v39 = vmul.f32 %v816_v36, %v423_v37 }
 0x11e   :  { %v830_v40 = vsel %vm828_vm1, %v827_v38, 0.0  ;;  %v829_v41 = vsel %vm828_vm1, %v826_v39, 0.0 }
 0x11f   :  { %v831_v43 = vadd.f32 %v830_v40, %v829_v41 }
 0x121   :  { %v832_v44 = vrot.slane %v831_v43, 4 }
 0x123   :  { %v833_v45 = vadd.f32 %v832_v44, %v831_v43 }
 0x125   :  { %v834_v47 = vrot.slane %v833_v45, 2 }
 0x127   :  { %v835_v48 = vadd.f32 %v834_v47, %v833_v45 }
 0x129   :  { %v836_v49 = vrot.slane %v835_v48, 1 }
 0x12b   :  { %v837_v50 = vadd.f32 %v836_v49, %v835_v48 }
 0x12d   :  { %v838_v51 = vmul.f32 0.03125, %v837_v50 }
 0x12f   :  { %1187 = vmatmul.mubr.msk.f32.vlgmr.msra.gmra.mxu0 %vm828_vm1, %v838_v51 }
 0x1ef   :  { %v919_v57 = vpop.f32.mrf.mxu0 }
 0x1f0   :  { %v920_v1 = vadd.f32 %v919_v57, %v847_v54 }
 0x1f1   :  { %v1188_v58 = vpop.f32.mrf.mxu0 }
 0x1f2   :  { %v923_v59 = vmax.f32 %v920_v1, 0.0 }
 0x1f4   :  { %1194 = vmatmul.mubr.msk.f32.vlgmr.msra.gmra.mxu1 %vm924_vm2, %v923_v59 }
 0x1f5   :  { %1200 = vmatprep.mubr.msk.f32.mxu1 %vm1261_vm6, %v1260_v0  ;;  %1197 = vmatpush3.msra.mxu1 %v846_v60 }
 0x1f6   :  { %1198 = vmatprep.subr.mxu1 %v1260_v0 }
 0x1f7   :  { %1199 = vmatpush3.msra.mxu1 %v845_v3 }
 0x2b4   :  { %v994_v6 = vpop.f32.mrf.mxu1 }
 0x2b5   :  { %v995_v2 = vadd.f32 %v994_v6, %v848_v4 }
 0x2b6   :  { %v1195_v7 = vpop.f32.mrf.mxu1 }
 0x2b7   :  { %v998_v8 = vmax.f32 %v995_v2, 0.0 }
 0x2b9   :  { %1201 = vmatmul.mubr.msk.f32.vlgmr.msra.gmra.mxu1 %vm924_vm2, %v998_v8 }
 0x379   :  { %v1068_v14 = vpop.f32.mrf.mxu1 }
 0x37a   :  { %v1069_v46 = vadd.f32 %v1068_v14, %v849_v12 }
 0x37b   :  { %v1202_v13 = vpop.f32.mrf.mxu1 }
 0x37c   :  { %v1073_v55 = vsel %vm1072_vm3, %v1069_v46, -inf }
 0x37d   :  { %1074 = vmax.xlane.f32.xlu0 %v1073_v55 }
 0x406   :  { %v1075_v56 = vpop.xlane.xlu0 %1074 }
 0x407   :  { %v1076_v24 = vsub.f32 %v1069_v46, %v1075_v56 }
 0x409   :  { %v1077_v61 = vmul.f32 1.442695, %v1076_v24 }
 0x40b   :  { %1209 = vpow2.f32 %v1077_v61 }
 0x418   :  { %v1210_v0 = vpop.eup %1209 }
 0x419   :  { %v1079_v62 = vsel %vm1072_vm3, %v1210_v0, 0.0 }
 0x41a   :  { %1080 = vadd.xlane.f32.xlu1 %v1079_v62 }
 0x4a3   :  { %v1081_v63 = vpop.xlane.xlu1 %1080 }
 0x4a4   :  { %1211 = vrcp.f32 %v1081_v63 }
 0x4b1   :  { %v1212_v9 = vpop.eup %1211 }
 0x4b2   :  { %v1083_v10 = vmul.f32 %v1212_v9, %v1210_v0 }
 0x4b4   :  { %1084 = vst.msk [vmem:[#allocation5] sm:$0x1] %vm1072_vm3, %v1083_v10 }
 0x4b5   :  { %1244 = shalt.err (!%p1241_p9)
}
 0x4b6   :  { %1094 = dma.vmem_to_hbm [thread:$0]  %s1092_s29, 16, %s1772_s3, [#allocation4]  }
 0x4b7   :  { %1255 = dma.done.wait [#allocation4], 16  }
 0x4b8   :  { %1256 = vsyncadd [#allocation4], 4294967280 }
 0x4b9   :  { %1098 = vsyncpa [#allocation3], 1 }
 0x4ba   :  { %1099 = vsyncpa [#allocation4], 1 }

</bundles_post_ra>
